<compile_context>
chip_gen: v5e
topology: v5e:2x2
jax: 0.10.0
libtpu: 0.0.40
codegen_flags: <defaults>
</compile_context>

<pallas_src>
import functools
import math

import jax
import jax.numpy as jnp
from jax.experimental import pallas as pl
from jax.experimental.pallas import tpu as pltpu


def _round_up(v, m):
    return (v + m - 1) // m * m


def _pad_to(a, shape):
    if tuple(a.shape) == tuple(shape):
        return a
    pads = [(0, t - s) for s, t in zip(a.shape, shape)]
    return jnp.pad(a, pads)


def _mod_mlp_kernel(x_ref, mod_ref, w1_ref, b1_ref, w2_ref, b2_ref, o_ref, *, din):
    """One (TILE_N, Dp) token tile of one batch element:
       LayerNorm -> modulate -> fc1 -> GELU(erf) -> fc2 -> gate."""
    x = x_ref[...].astype(jnp.float32)                      # (TN, Dp)
    dp = x.shape[-1]
    inv_d = 1.0 / din

    # LayerNorm over the *real* Din lanes (padded lanes are zero), eps=1e-6, no affine.
    mean = jnp.sum(x, axis=-1, keepdims=True) * inv_d
    xc = x - mean
    if dp != din:
        lane = jax.lax.broadcasted_iota(jnp.int32, x.shape, 1)
        xc = jnp.where(lane < din, xc, 0.0)                 # mask padded lanes
    var = jnp.sum(xc * xc, axis=-1, keepdims=True) * inv_d
    xn = xc * jax.lax.rsqrt(var + 1e-6)

    # Fused per-batch modulation rows: [shift, 1+scale, gate], each (1, Dp).
    m = mod_ref[...]                                        # (3, Dp) f32
    shift = m[0:1, :]
    scale1 = m[1:2, :]
    gate = m[2:3, :]

    # modulate(x, shift, scale) = x * (1 + scale) + shift   (broadcast over tokens)
    mod = xn * scale1 + shift                               # (TN, Dp)

    # Mlp: fc1 -> exact GELU -> fc2   (bf16 MXU operands, f32 accumulation)
    h = jnp.dot(mod.astype(jnp.bfloat16), w1_ref[...],
                preferred_element_type=jnp.float32) + b1_ref[...]
    h = 0.5 * h * (1.0 + jax.lax.erf(h * (1.0 / math.sqrt(2.0))))   # nn.GELU() (erf)
    y = jnp.dot(h.astype(jnp.bfloat16), w2_ref[...],
                preferred_element_type=jnp.float32) + b2_ref[...]

    # output gate
    o_ref[...] = (y * gate).astype(o_ref.dtype)


def modulated_linear_block(x, c, params, *, tile_n=256):
    """x: (B, N, Din) f32, c: (B, cond_dim) f32."""
    B, N, Din = x.shape
    H = params["w1"].shape[1]          # hidden_features = output_dim
    Dout = params["w2"].shape[1]       # == Din (timm Mlp out_features default)
    assert Dout == Din, "gate broadcast requires output_dim == input_dim (as in the module)"

    # --- conditioning glue (tiny matmuls on c) in plain JAX ---
    sc = jax.nn.silu(c)
    mod_in = sc @ params["w_mod_in"] + params["b_mod_in"]      # (B, 2*Din)
    shift, scale = jnp.split(mod_in, 2, axis=1)                # each (B, Din)
    gate = sc @ params["w_mod_out"] + params["b_mod_out"]      # (B, Dout)

    # --- lane-dense padding + token tiling ---
    Dp = _round_up(Din, 128)
    Hp = _round_up(H, 128)
    tn = min(tile_n, _round_up(N, 8))
    Np = _round_up(N, tn)

    x_p = _pad_to(x, (B, Np, Dp))
    # Fuse shift / (1+scale) / gate into one per-batch (3, Din) tensor -> single DMA.
    mod_rows = jnp.stack([shift, 1.0 + scale, gate], axis=1)   # (B, 3, Din)
    mod_p = _pad_to(mod_rows, (B, 3, Dp))
    w1_p = _pad_to(params["w1"], (Dp, Hp)).astype(jnp.bfloat16)
    b1_p = _pad_to(params["b1"].reshape(1, H), (1, Hp))
    w2_p = _pad_to(params["w2"], (Hp, Dp)).astype(jnp.bfloat16)
    b2_p = _pad_to(params["b2"].reshape(1, Dout), (1, Dp))

    grid = (B, Np // tn)
    kernel = functools.partial(_mod_mlp_kernel, din=Din)

    flops = 4 * B * Np * Dp * Hp                      # two matmuls, 2 flops/MAC
    transcendentals = B * Np * Hp                     # erf per hidden element
    bytes_accessed = (x_p.size * 4 + B * Np * Dp * 4  # x in, y out (f32)
                      + 2 * Dp * Hp * 2               # bf16 weights
                      + 3 * B * Dp * 4 + (Hp + Dp) * 4)

    out_p = pl.pallas_call(
        kernel,
        out_shape=jax.ShapeDtypeStruct((B, Np, Dp), x.dtype),
        grid_spec=pltpu.PrefetchScalarGridSpec(
            num_scalar_prefetch=0,
            grid=grid,
            in_specs=[
                pl.BlockSpec((None, tn, Dp), lambda b, t: (b, t, 0)),   # x tile (squeezed B)
                pl.BlockSpec((None, 3, Dp), lambda b, t: (b, 0, 0)),    # [shift,1+scale,gate]
                pl.BlockSpec((Dp, Hp), lambda b, t: (0, 0)),            # w1 (bf16, resident)
                pl.BlockSpec((1, Hp), lambda b, t: (0, 0)),             # b1 (f32)
                pl.BlockSpec((Hp, Dp), lambda b, t: (0, 0)),            # w2 (bf16, resident)
                pl.BlockSpec((1, Dp), lambda b, t: (0, 0)),             # b2 (f32)
            ],
            out_specs=pl.BlockSpec((None, tn, Dp), lambda b, t: (b, t, 0)),
        ),
        compiler_params=pltpu.CompilerParams(
            dimension_semantics=("parallel", "parallel"),
            vmem_limit_bytes=48 * 1024 * 1024,
        ),
        cost_estimate=pl.CostEstimate(
            flops=flops,
            transcendentals=transcendentals,
            bytes_accessed=bytes_accessed),
    )(x_p, mod_p, w1_p, b1_p, w2_p, b2_p)

    return out_p[:, :N, :Din]


def _reference(x, c, params):
    """Pure-JAX f32 reference of the PyTorch module's forward."""
    sc = jax.nn.silu(c)
    mod_in = sc @ params["w_mod_in"] + params["b_mod_in"]
    shift, scale = jnp.split(mod_in, 2, axis=1)
    gate = sc @ params["w_mod_out"] + params["b_mod_out"]
    mean = jnp.mean(x, axis=-1, keepdims=True)
    var = jnp.mean((x - mean) ** 2, axis=-1, keepdims=True)
    xn = (x - mean) * jax.lax.rsqrt(var + 1e-6)
    mod = xn * (1.0 + scale[:, None, :]) + shift[:, None, :]
    h = mod @ params["w1"] + params["b1"]
    h = 0.5 * h * (1.0 + jax.lax.erf(h / jnp.sqrt(2.0)))
    y = h @ params["w2"] + params["b2"]
    return gate[:, None, :] * y


def init_params(key, input_dim, output_dim, cond_dim):
    ks = jax.random.split(key, 8)
    s = 0.02
    return {
        # Mlp: fc1 (Din -> hidden=output_dim), fc2 (hidden -> Din)
        "w1": s * jax.random.normal(ks[0], (input_dim, output_dim), jnp.float32),
        "b1": s * jax.random.normal(ks[1], (output_dim,), jnp.float32),
        "w2": s * jax.random.normal(ks[2], (output_dim, input_dim), jnp.float32),
        "b2": s * jax.random.normal(ks[3], (input_dim,), jnp.float32),
        # input_modulation: Linear(cond_dim -> 2*input_dim)
        "w_mod_in": s * jax.random.normal(ks[4], (cond_dim, 2 * input_dim), jnp.float32),
        "b_mod_in": s * jax.random.normal(ks[5], (2 * input_dim,), jnp.float32),
        # output_modulation: Linear(cond_dim -> output_dim)
        "w_mod_out": s * jax.random.normal(ks[6], (cond_dim, output_dim), jnp.float32),
        "b_mod_out": s * jax.random.normal(ks[7], (output_dim,), jnp.float32),
    }


if __name__ == "__main__":
    B, N = 2, 8
    input_dim = output_dim = 32   # must match so the gate broadcast is valid (as in the module)
    cond_dim = 16

    key = jax.random.PRNGKey(0)
    kx, kc, kp = jax.random.split(key, 3)
    x = jax.random.normal(kx, (B, N, input_dim), jnp.float32)
    c = jax.random.normal(kc, (B, cond_dim), jnp.float32)
    params = init_params(kp, input_dim, output_dim, cond_dim)

    y = modulated_linear_block(x, c, params)
    jax.block_until_ready(y)
    assert y.shape == (B, N, input_dim)

    # bf16 matmul operands with f32 accumulation -> loose tolerance vs f32 reference.
    y_ref = _reference(x, c, params)
    assert jnp.allclose(y, y_ref, rtol=5e-2, atol=1e-4), \
        f"max abs err {float(jnp.max(jnp.abs(y - y_ref)))}"
    print("KERNEL_OK")
</pallas_src>

<mosaic_0001>
module attributes {stable_mosaic.version = 11 : i64} {
  func.func @_mod_mlp_kernel(%arg0: i32, %arg1: i32, %arg2: memref<1x8x128xf32, #tpu.memory_space<vmem>>, %arg3: memref<1x3x128xf32, #tpu.memory_space<vmem>>, %arg4: memref<128x128xbf16, #tpu.memory_space<vmem>>, %arg5: memref<1x128xf32, #tpu.memory_space<vmem>>, %arg6: memref<128x128xbf16, #tpu.memory_space<vmem>>, %arg7: memref<1x128xf32, #tpu.memory_space<vmem>>, %arg8: memref<1x8x128xf32, #tpu.memory_space<vmem>>) attributes {dimension_semantics = [#tpu.dimension_semantics<parallel>, #tpu.dimension_semantics<parallel>], iteration_bounds = array<i64: 2, 1>, scalar_prefetch = 0 : i64, scratch_operands = 0 : i64, tpu.core_type = #tpu.core_type<tc>, window_params = [{transform_indices = @transform_0, window_bounds = array<i64: 1, 8, 128>}, {transform_indices = @transform_1, window_bounds = array<i64: 1, 3, 128>}, {pipeline_mode = #tpu.pipeline_mode<synchronous>, transform_indices = @transform_2, window_bounds = array<i64: 128, 128>}, {pipeline_mode = #tpu.pipeline_mode<synchronous>, transform_indices = @transform_3, window_bounds = array<i64: 1, 128>}, {pipeline_mode = #tpu.pipeline_mode<synchronous>, transform_indices = @transform_4, window_bounds = array<i64: 128, 128>}, {pipeline_mode = #tpu.pipeline_mode<synchronous>, transform_indices = @transform_5, window_bounds = array<i64: 1, 128>}, {transform_indices = @transform_6, window_bounds = array<i64: 1, 8, 128>}]} {
    %c0 = arith.constant 0 : index
    %c0_0 = arith.constant 0 : index
    %c0_1 = arith.constant 0 : index
    %0 = vector.load %arg2[%c0, %c0_0, %c0_1] : memref<1x8x128xf32, #tpu.memory_space<vmem>>, vector<1x8x128xf32>
    %1 = vector.shape_cast %0 : vector<1x8x128xf32> to vector<8x128xf32>
    %cst = arith.constant dense<0.000000e+00> : vector<8xf32>
    %2 = vector.multi_reduction <add>, %1, %cst [1] : vector<8x128xf32> to vector<8xf32>
    %3 = vector.shape_cast %2 : vector<8xf32> to vector<8x1xf32>
    %cst_2 = arith.constant 3.125000e-02 : f32
    %4 = vector.broadcast %cst_2 : f32 to vector<8x1xf32>
    %5 = arith.mulf %3, %4 : vector<8x1xf32>
    %6 = vector.broadcast %5 : vector<8x1xf32> to vector<8x128xf32>
    %7 = arith.subf %1, %6 : vector<8x128xf32>
    %8 = tpu.iota {dimensions = array<i32: 1>} : vector<8x128xi32>
    %c32_i32 = arith.constant 32 : i32
    %9 = vector.broadcast %c32_i32 : i32 to vector<8x128xi32>
    %10 = arith.cmpi slt, %8, %9 : vector<8x128xi32>
    %cst_3 = arith.constant 0.000000e+00 : f32
    %11 = vector.broadcast %cst_3 : f32 to vector<8x128xf32>
    %12 = arith.select %10, %7, %11 : vector<8x128xi1>, vector<8x128xf32>
    %13 = arith.mulf %12, %12 : vector<8x128xf32>
    %cst_4 = arith.constant dense<0.000000e+00> : vector<8xf32>
    %14 = vector.multi_reduction <add>, %13, %cst_4 [1] : vector<8x128xf32> to vector<8xf32>
    %15 = vector.shape_cast %14 : vector<8xf32> to vector<8x1xf32>
    %cst_5 = arith.constant 3.125000e-02 : f32
    %16 = vector.broadcast %cst_5 : f32 to vector<8x1xf32>
    %17 = arith.mulf %15, %16 : vector<8x1xf32>
    %cst_6 = arith.constant 9.99999997E-7 : f32
    %18 = vector.broadcast %cst_6 : f32 to vector<8x1xf32>
    %19 = arith.addf %17, %18 : vector<8x1xf32>
    %20 = math.rsqrt %19 : vector<8x1xf32>
    %21 = vector.broadcast %20 : vector<8x1xf32> to vector<8x128xf32>
    %22 = arith.mulf %12, %21 : vector<8x128xf32>
    %c0_7 = arith.constant 0 : index
    %c0_8 = arith.constant 0 : index
    %c0_9 = arith.constant 0 : index
    %23 = vector.load %arg3[%c0_7, %c0_8, %c0_9] : memref<1x3x128xf32, #tpu.memory_space<vmem>>, vector<1x3x128xf32>
    %24 = vector.shape_cast %23 : vector<1x3x128xf32> to vector<3x128xf32>
    %25 = vector.extract_strided_slice %24 {offsets = [0, 0], sizes = [1, 128], strides = [1, 1]} : vector<3x128xf32> to vector<1x128xf32>
    %26 = vector.extract_strided_slice %24 {offsets = [1, 0], sizes = [1, 128], strides = [1, 1]} : vector<3x128xf32> to vector<1x128xf32>
    %27 = vector.extract_strided_slice %24 {offsets = [2, 0], sizes = [1, 128], strides = [1, 1]} : vector<3x128xf32> to vector<1x128xf32>
    %28 = vector.broadcast %26 : vector<1x128xf32> to vector<8x128xf32>
    %29 = arith.mulf %22, %28 : vector<8x128xf32>
    %30 = vector.broadcast %25 : vector<1x128xf32> to vector<8x128xf32>
    %31 = arith.addf %29, %30 : vector<8x128xf32>
    %32 = arith.truncf %31 : vector<8x128xf32> to vector<8x128xbf16>
    %c0_10 = arith.constant 0 : index
    %c0_11 = arith.constant 0 : index
    %33 = vector.load %arg4[%c0_10, %c0_11] : memref<128x128xbf16, #tpu.memory_space<vmem>>, vector<128x128xbf16>
    %cst_12 = arith.constant dense<0.000000e+00> : vector<8x128xf32>
    %34 = tpu.matmul %32, %33, %cst_12 {dimension_numbers = #tpu.dot_dimension_numbers<[1], [0], [0], [1], [0, 0, 1, 1], [], []>} : vector<8x128xbf16>, vector<128x128xbf16>, vector<8x128xf32> -> vector<8x128xf32>
    %c0_13 = arith.constant 0 : index
    %c0_14 = arith.constant 0 : index
    %35 = vector.load %arg5[%c0_13, %c0_14] : memref<1x128xf32, #tpu.memory_space<vmem>>, vector<1x128xf32>
    %36 = vector.broadcast %35 : vector<1x128xf32> to vector<8x128xf32>
    %37 = arith.addf %34, %36 : vector<8x128xf32>
    %cst_15 = arith.constant 5.000000e-01 : f32
    %38 = vector.broadcast %cst_15 : f32 to vector<8x128xf32>
    %39 = arith.mulf %38, %37 : vector<8x128xf32>
    %cst_16 = arith.constant 0.707106769 : f32
    %40 = vector.broadcast %cst_16 : f32 to vector<8x128xf32>
    %41 = arith.mulf %37, %40 : vector<8x128xf32>
    %42 = math.erf %41 : vector<8x128xf32>
    %cst_17 = arith.constant 1.000000e+00 : f32
    %43 = vector.broadcast %cst_17 : f32 to vector<8x128xf32>
    %44 = arith.addf %43, %42 : vector<8x128xf32>
    %45 = arith.mulf %39, %44 : vector<8x128xf32>
    %46 = arith.truncf %45 : vector<8x128xf32> to vector<8x128xbf16>
    %c0_18 = arith.constant 0 : index
    %c0_19 = arith.constant 0 : index
    %47 = vector.load %arg6[%c0_18, %c0_19] : memref<128x128xbf16, #tpu.memory_space<vmem>>, vector<128x128xbf16>
    %cst_20 = arith.constant dense<0.000000e+00> : vector<8x128xf32>
    %48 = tpu.matmul %46, %47, %cst_20 {dimension_numbers = #tpu.dot_dimension_numbers<[1], [0], [0], [1], [0, 0, 1, 1], [], []>} : vector<8x128xbf16>, vector<128x128xbf16>, vector<8x128xf32> -> vector<8x128xf32>
    %c0_21 = arith.constant 0 : index
    %c0_22 = arith.constant 0 : index
    %49 = vector.load %arg7[%c0_21, %c0_22] : memref<1x128xf32, #tpu.memory_space<vmem>>, vector<1x128xf32>
    %50 = vector.broadcast %49 : vector<1x128xf32> to vector<8x128xf32>
    %51 = arith.addf %48, %50 : vector<8x128xf32>
    %52 = vector.broadcast %27 : vector<1x128xf32> to vector<8x128xf32>
    %53 = arith.mulf %51, %52 : vector<8x128xf32>
    %c0_23 = arith.constant 0 : index
    %c0_24 = arith.constant 0 : index
    %c0_25 = arith.constant 0 : index
    %54 = vector.load %arg8[%c0_23, %c0_24, %c0_25] : memref<1x8x128xf32, #tpu.memory_space<vmem>>, vector<1x8x128xf32>
    %55 = vector.shape_cast %54 : vector<1x8x128xf32> to vector<8x128xf32>
    %56 = vector.shape_cast %53 : vector<8x128xf32> to vector<1x8x128xf32>
    tpu.vector_store %arg8[%c0_23, %c0_24, %c0_25], %56 {strides = array<i32>} : memref<1x8x128xf32, #tpu.memory_space<vmem>>, vector<1x8x128xf32>,
    return
  }
  func.func @transform_0(%arg0: i32, %arg1: i32) -> (i32, i32, i32) {
    %c0_i32 = arith.constant 0 : i32
    %c0_i32_0 = arith.constant 0 : i32
    return %arg0, %arg1, %c0_i32 : i32, i32, i32
  }
  func.func @transform_1(%arg0: i32, %arg1: i32) -> (i32, i32, i32) {
    %c0_i32 = arith.constant 0 : i32
    %c0_i32_0 = arith.constant 0 : i32
    %c0_i32_1 = arith.constant 0 : i32
    return %arg0, %c0_i32, %c0_i32_0 : i32, i32, i32
  }
  func.func @transform_2(%arg0: i32, %arg1: i32) -> (i32, i32) {
    %c0_i32 = arith.constant 0 : i32
    %c0_i32_0 = arith.constant 0 : i32
    %c0_i32_1 = arith.constant 0 : i32
    return %c0_i32, %c0_i32_0 : i32, i32
  }
  func.func @transform_3(%arg0: i32, %arg1: i32) -> (i32, i32) {
    %c0_i32 = arith.constant 0 : i32
    %c0_i32_0 = arith.constant 0 : i32
    %c0_i32_1 = arith.constant 0 : i32
    return %c0_i32, %c0_i32_0 : i32, i32
  }
  func.func @transform_4(%arg0: i32, %arg1: i32) -> (i32, i32) {
    %c0_i32 = arith.constant 0 : i32
    %c0_i32_0 = arith.constant 0 : i32
    %c0_i32_1 = arith.constant 0 : i32
    return %c0_i32, %c0_i32_0 : i32, i32
  }
  func.func @transform_5(%arg0: i32, %arg1: i32) -> (i32, i32) {
    %c0_i32 = arith.constant 0 : i32
    %c0_i32_0 = arith.constant 0 : i32
    %c0_i32_1 = arith.constant 0 : i32
    return %c0_i32, %c0_i32_0 : i32, i32
  }
  func.func @transform_6(%arg0: i32, %arg1: i32) -> (i32, i32, i32) {
    %c0_i32 = arith.constant 0 : i32
    %c0_i32_0 = arith.constant 0 : i32
    return %arg0, %arg1, %c0_i32 : i32, i32, i32
  }
}

</mosaic_0001>

<bundles_post_ra>
// kernel: tpu_custom_call.1
= control target key start
LH: loop header
LB: loop body
LE: loop exit
PB: predicated region body
PF: predicated region fallthrough
CT: control target
= control target key end

     0   :  { %11 = vsyncpa [#allocation3], 0  ;;  %s1276_s0 = inlined_call_operand.hbm [shape: f32[2,8,128], index: 0, kind: input, shape index: {}]   ;;  %s1277_s1 = inlined_call_operand.vmem [shape: f32[2,3,128], index: 1, kind: input, shape index: {}]   ;;  %s1278_s2 = inlined_call_operand.hbm [shape: bf16[128,128], index: 2, kind: input, shape index: {}]   ;;  %s1279_s3 = inlined_call_operand.vmem [shape: f32[1,128], index: 3, kind: input, shape index: {}]   ;;  %s1280_s4 = inlined_call_operand.hbm [shape: bf16[128,128], index: 4, kind: input, shape index: {}]   ;;  %s1281_s5 = inlined_call_operand.vmem [shape: f32[1,128], index: 5, kind: input, shape index: {}]   ;;  %s1282_s6 = inlined_call_operand.hbm [shape: f32[2,8,128], index: 6, kind: output, shape index: {}]  }
   0x1   :  { %13 = vsyncpa [#allocation3 + $0x1], 0 }
   0x2   :  { %14 = vsyncpa [#allocation6], 0 }
   0x3   :  { %15 = vsyncpa [#allocation4], 0 }
   0x4   :  { %17 = vsyncpa [#allocation4 + $0x1], 0  ;;  %s1112_s21 = smov 0   ;;  %s1114_s22 = smov 0  }
   0x5   :  { %s1116_s23 = smov 0   ;;  %s1118_s24 = smov 0  }
   0x6   :  { %s1120_s25 = smov 0   ;;  %s1122_s26 = smov 0  }
   0x7 LB: > { %s705_s27 = sadd.s32 4294967295, %s1071_s26   ;;  %p707_p0 = scmp.ge.s32.totalorder %s1071_s26, 1  ;;  %s1071_s26 = sphi %s1122_s26, %s23_s26   ;;  %s1067_s25 = sphi %s1120_s25, %s1292_s25   ;;  %s1063_s24 = sphi %s1118_s24, %s1291_s24   ;;  %s1059_s23 = sphi %s1116_s23, %s1290_s23   ;;  %s1055_s22 = sphi %s1114_s22, %s1289_s22   ;;  %s1051_s21 = sphi %s1112_s21, %s1288_s21  }
   0x8   : > { %p1146_p1 = scmp.eq.s32.totalorder %s705_s27, 0  ;;  %p206_p2 = scmp.lt.s32.totalorder %s1071_s26, 3 }
   0x9   : > { %s217_s7 = sshll.u32 %s1278_s2, 4  ;;  %s1073_s9 = smov [#allocation5]   ;;  %s218_s7 = int_to_ptr.hbm [resolvable:$true] %s217_s7 }
   0xa   : > { %p1154_p3 = pnand %p707_p0, %p206_p2  ;;  %s219_s10 = sshll.u32 %s1073_s9, 4  ;;  %s220_s10 = int_to_ptr.vmem [resolvable:$true] %s219_s10 }
   0xb   : > { %p710_p6 = scmp.ge.s32.totalorder %s1071_s26, 2  ;;  %s234_s13 = sshll.u32 %s1280_s4, 4  ;;  %s235_s13 = int_to_ptr.hbm [resolvable:$true] %s234_s13 }
   0xc   : > { %p816_p4 = pneg %p1154_p3  ;;  %s1074_s14 = smov 64  }
   0xd   : > { %s1075_s15 = smov 4   ;;  %s1076_s16 = smov [#allocation7]  }
   0xe   : > { %p817_p5 = pnand %p816_p4, %p1146_p1  ;;  %s236_s17 = sshll.u32 %s1076_s16, 4  ;;  %s237_s17 = int_to_ptr.vmem [resolvable:$true] %s236_s17 }
   0xf   : > { %s35_s18 = sadd.s32 1, %s1067_s25  ;;  %s706_s19 = sadd.s32 4294967294, %s1071_s26  }
  0x10   : > { %819 = dma.hbm_to_vmem [thread:$0]  (!%p817_p5), %s218_s7, 1024, %s220_s10, [#allocation6], %s1074_s14, %s1074_s14, %s1075_s15  }
  0x11   : > { %822 = dma.hbm_to_vmem [thread:$0]  (!%p817_p5), %s235_s13, 1024, %s237_s17, [#allocation6], %s1074_s14, %s1074_s14, %s1075_s15  }
  0x12   : > { %p37_p7 = scmp.ge.s32.totalorder %s35_s18, 2  ;;  %s44_s20 = sadd.s32 1, %s1059_s23 }
  0x13   : > { %p51_p8 = scmp.ne.s32.totalorder %s1059_s23, %s1055_s22  ;;  %p52_p9 = scmp.eq.s32.totalorder %s1071_s26, 0 }
  0x14   : > { %s1294_s18 = smov (%p37_p7, %s35_s18), 0  ;;  %p57_p10 = scmp.ne.s32.totalorder %s1055_s22, %s1051_s21 }
  0x15   : > { %s39_s29 = ssub.s32 %s1067_s25, %s1294_s18  ;;  %p193_p11 = scmp.eq.s32.totalorder %s705_s27, 1 }
  0x16   : > { %p42_p12 = scmp.eq.s32.totalorder %s39_s29, 0  ;;  %p1182_p13 = por %p1146_p1, %p57_p10 }
  0x17   : > { %p1186_p0 = por %p193_p11, %p51_p8  ;;  %p199_p2 = scmp.eq.s32.totalorder %s706_s19, 1 }
  0x18   : > { %s1191_s9 = scalar_select %p42_p12, %s1059_s23, %s44_s20  }
  0x19   : > { %p53_p4 = por %p52_p9, %p51_p8  ;;  %p1193_p5 = por %p199_p2, %p57_p10 }
  0x1a   : > { %s253_s11 = sand.u32 1, %s1059_s23   ;;  %s712_s27 = sshll.u32 %s1067_s25, 3 }
  0x1b   : > { %p833_p7 = scmp.lt.s32.totalorder %s1071_s26, 2  ;;  %s711_s12 = sshll.u32 %s253_s11, 3 }
  0x1c   : > { %s262_s15 = scalar_lea.hbm %s1276_s0, %s712_s27  ;;  %s257_s17 = scalar_lea.vmem [#allocation2], %s711_s12 }
  0x1d   : > { %s264_s16 = sshll.u32 %s262_s15, 4  ;;  %s266_s29 = sshll.u32 %s257_s17, 4  ;;  %s265_s16 = int_to_ptr.hbm [resolvable:$true] %s264_s16  ;;  %s267_s29 = int_to_ptr.vmem [resolvable:$true] %s266_s29 }
  0x1e   : > { %p824_p11 = pnand %p833_p7, %p53_p4  ;;  %s254_s19 = scalar_lea.sflag [#allocation3], %s253_s11 }
  0x1f   : > { %282 = sbr.rel (%p1154_p3) target bundleno = 624 (0x270), region = 44  ;;  %s1206_s20 = sand.u32 (!%p1154_p3), 1, %s1055_s22  }
  0x20   : > { %826 = dma.hbm_to_vmem [thread:$0]  (!%p824_p11), %s265_s16, 128, %s267_s29, %s254_s19  }
  0x21   : > { %s714_s13 = sshll.u32 (!%p1154_p3), %s1206_s20, 3  ;;  %s285_s27 = scalar_lea.sflag (!%p1154_p3), [#allocation3], %s1206_s20 }
  0x22   : > { %s288_s12 = scalar_lea.vmem (!%p1154_p3), [#allocation2], %s714_s13 }
  0x24   : > { %1038 = dma.done.wait (%p1182_p13), %s285_s27, 128  }
  0x25   : > { %1040 = vsyncadd (%p1182_p13), %s285_s27, 4294967168 }
  0x26   : > { %1042 = dma.done.wait (%p1146_p1), [#allocation6], 2048  }
  0x27   : > { %1044 = vsyncadd (%p1146_p1), [#allocation6], 4294965248  ;;  %v336_v0 = vld [vmem:[%s288_s12] sm:$0xff]  ;;  %v341_v2 = vlaneseq  ;;  %v793_v10 = vld [vmem:[#allocation5 + $0x28] sm:$0xff]  ;;  %p332_p1 = scmp.lt.s32.totalorder %s1063_s24, 1  ;;  %s785_s17 = sshll.u32 %s1063_s24, 3 }
  0x28   : > { %337 = vadd.xlane.f32.xlu0 %v336_v0  ;;  %v795_v1 = vld [vmem:[#allocation5 + $0x38] sm:$0xff]  ;;  %v794_v9 = vld [vmem:[#allocation5 + $0x30] sm:$0xff]  ;;  %v792_v11 = vld [vmem:[#allocation5 + $0x20] sm:$0xff]  ;;  %s1005_s29 = scalar_lea.hbm %s1282_s6, 16 }
  0x29   : > { %435 = vmatpush.bf16.msra.mxu0 %v795_v1  ;;  %v342_v3 = vand.u32 127, %v341_v2  ;;  %v791_v12 = vld [vmem:[#allocation5 + $0x18] sm:$0xff]  ;;  %v790_v13 = vld [vmem:[#allocation5 + $0x10] sm:$0xff]  ;;  %v789_v14 = vld [vmem:[#allocation5 + $0x8] sm:$0xff]  ;;  %s333_s28 = scalar_select %p332_p1, %s1063_s24, 1 }
  0x2a   : > { %v788_v15 = vld [vmem:[#allocation5] sm:$0xff]  ;;  %v803_v33 = vld [vmem:[#allocation7 + $0x38] sm:$0xff]  ;;  %v802_v34 = vld [vmem:[#allocation7 + $0x30] sm:$0xff]  ;;  %s578_s24 = scalar_lea.sflag [#allocation4], %s1206_s20 }
  0x2b   : > { %vm343_vm0 = vcmp.lt.s32.totalorder %v342_v3, 32  ;;  %s718_s8 = sshll.u32 %s333_s28, 2  ;;  %561 = vmatpush.bf16.msra.mxu1 %v803_v33  ;;  %v889_v35 = vld [vmem:[%s1279_s3] ss:$0 sm:$0xff]  ;;  %v801_v36 = vld [vmem:[#allocation7 + $0x28] sm:$0xff]  ;;  %v800_v39 = vld [vmem:[#allocation7 + $0x20] sm:$0xff]  ;;  %s589_s28 = scalar_lea.hbm %s1282_s6, %s785_s17 }
  0x2c   : > { %s335_s14 = scalar_lea.vmem %s1277_s1, %s718_s8  ;;  %v799_v42 = vld [vmem:[#allocation7 + $0x18] sm:$0xff]  ;;  %v798_v46 = vld [vmem:[#allocation7 + $0x10] sm:$0xff]  ;;  %v797_v51 = vld [vmem:[#allocation7 + $0x8] sm:$0xff]  ;;  %s331_s8 = scalar_lea.vmem [#allocation8], %s714_s13 }
  0x2d   : > { %436 = vmatpush.bf16.msra.mxu0 %v794_v9  ;;  %v1225_v24 = vld [vmem:[%s335_s14] sm:$0x7]  ;;  %v796_v55 = vld [vmem:[#allocation7] sm:$0xff]  ;;  %s591_s30 = sshll.u32 %s331_s8, 4  ;;  %s593_s11 = sshll.u32 %s589_s28, 4  ;;  %s592_s30 = int_to_ptr.vmem [resolvable:$true] %s591_s30  ;;  %s594_s11 = int_to_ptr.hbm [resolvable:$true] %s593_s11 }
  0x2e   : > { %v362_v26 = vperm.slane %v1225_v24, 1  ;;  %v364_v29 = vperm.slane %v1225_v24, 0  ;;  %s999_s14 = sshra.s32 %s594_s11, 4  ;;  %s1000_s14 = int_to_ptr.hbm [resolvable:$true] %s999_s14 }
  0x2f   : > { %562 = vmatpush.bf16.msra.mxu1 %v802_v34  ;;  %s1001_s15 = scalar_lea.hbm %s1000_s14, 8  ;;  %p1006_p10 = scmp.lt.s32.totalorder %s1000_s14, %s1282_s6 }
  0x30   : > { %p1002_p3 = scmp.ne.s32.totalorder %s1000_s14, %s1001_s15  ;;  %p1007_p12 = scmp.lt.s32.totalorder %s1005_s29, %s1001_s15 }
  0x31   : > { %437 = vmatpush.bf16.msra.mxu0 %v793_v10 }
  0x32   : > { %p1003_p8 = pnand %p1002_p3, %p1186_p0  ;;  %p1008_p13 = por %p1007_p12, %p1006_p10 }
  0x33   : > { %563 = vmatpush.bf16.msra.mxu1 %v801_v36 }
  0x34   : > { %p1004_p9 = pneg %p1003_p8 }
  0x35   : > { %438 = vmatpush.bf16.msra.mxu0 %v792_v11 }
  0x36   : > { %p1009_p2 = pnand %p1008_p13, %p1004_p9 }
  0x37   : > { %564 = vmatpush.bf16.msra.mxu1 %v800_v39 }
  0x39   : > { %439 = vmatpush.bf16.msra.mxu0 %v791_v12 }
  0x3b   : > { %565 = vmatpush.bf16.msra.mxu1 %v799_v42 }
  0x3d   : > { %440 = vmatpush.bf16.msra.mxu0 %v790_v13 }
  0x3f   : > { %566 = vmatpush.bf16.msra.mxu1 %v798_v46 }
  0x41   : > { %441 = vmatpush.bf16.msra.mxu0 %v789_v14 }
  0x43   : > { %567 = vmatpush.bf16.msra.mxu1 %v797_v51 }
  0x45   : > { %442 = vmatpush.bf16.msra.mxu0 %v788_v15 }
  0x47   : > { %568 = vmatpush.bf16.msra.mxu1 %v796_v55 }
  0x9b   : > { %v338_v4 = vpop.xlane.xlu0 %337 }
  0x9c   : > { %v339_v5 = vmul.f32 0.03125, %v338_v4 }
  0x9e   : > { %v340_v6 = vsub.f32 %v336_v0, %v339_v5 }
  0xa0   : > { %v344_v7 = vsel %vm343_vm0, %v340_v6, 0.0 }
  0xa1   : > { %v345_v8 = vmul.f32 %v344_v7, %v344_v7 }
  0xa3   : > { %346 = vadd.xlane.f32.xlu0 %v345_v8 }
 0x116   : > { %v347_v16 = vpop.xlane.xlu0 %346 }
 0x117   : > { %v348_v17 = vmul.f32 0.03125, %v347_v16 }
 0x119   : > { %v349_v18 = vadd.f32 1e-06, %v348_v17 }
 0x11b   : > { %891 = vrsqrt.f32 %v349_v18  ;;  %vm356_vm2 = vweird.f32 %v349_v18 }
 0x121   : > { %v892_v19 = vpop.eup %891 }
 0x122   : > { %v351_v20 = vmul.f32 %v892_v19, %v349_v18  ;;  %vm357_vm1 = vweird.f32 %v892_v19 }
 0x123   : > { %vm358_vm3 = vmor %vm356_vm2, %vm357_vm1 }
 0x124   : > { %v352_v21 = vmul.f32 %v892_v19, %v351_v20 }
 0x126   : > { %v353_v22 = vmul.f32 0.5, %v352_v21  ;;  %v890_v21 = vld [vmem:[%s1281_s5] ss:$0 sm:$0xff] }
 0x128   : > { %v354_v23 = vsub.f32 1.5, %v353_v22  ;;  %v574_v22 = vperm.slane %v1225_v24, 2 }
 0x12a   : > { %v355_v25 = vmul.f32 %v892_v19, %v354_v23 }
 0x12c   : > { %v359_v27 = vsel %vm358_vm3, %v892_v19, %v355_v25 }
 0x12d   : > { %v360_v28 = vmul.f32 %v359_v27, %v344_v7 }
 0x12f   : > { %v363_v30 = vmul.f32 %v362_v26, %v360_v28 }
 0x131   : > { %v365_v31 = vadd.f32 %v364_v29, %v363_v30 }
 0x133   : > { %v366_v32 = vpack.c.bf16 %v365_v31, %v365_v31 }
 0x135   : > { %443 = vmatmul.bf16.vlgmr.msra.gmra.mxu0 %v366_v32 }
 0x1b2   : > { %v444_v37 = vpop.f32.mrf.mxu0 }
 0x1b3   : > { %v445_v38 = vadd.f32 %v889_v35, %v444_v37 }
 0x1b5   : > { %v449_v40 = vmul.f32 0.70710677, %v445_v38  ;;  %v448_v17 = vmul.f32 0.5, %v445_v38 }
 0x1b7   : > { %v450_v41 = vmul.f32 %v449_v40, %v449_v40 }
 0x1b9   : > { %v451_v43 = vmin.f32 %v450_v41, 16.0 }
 0x1ba   : > { %v446_v44 = vpop.f32.mrf.mxu0 }
 0x1bb   : > { %v452_v45 = vmul.f32 2.1237322e-06, %v451_v43  ;;  %v463_v47 = vmul.f32 3.8918573e-05, %v451_v43 }
 0x1bd   : > { %v453_v48 = vadd.f32 0.00028619796, %v452_v45  ;;  %v464_v49 = vadd.f32 0.001143296, %v463_v47 }
 0x1bf   : > { %v454_v50 = vmul.f32 %v453_v48, %v451_v43  ;;  %v465_v52 = vmul.f32 %v464_v49, %v451_v43 }
 0x1c1   : > { %v466_v53 = vadd.f32 0.014752088, %v465_v52  ;;  %v455_v54 = vadd.f32 0.0036580483, %v454_v50 }
 0x1c3   : > { %v467_v56 = vmul.f32 %v466_v53, %v451_v43  ;;  %v456_v58 = vmul.f32 %v455_v54, %v451_v43 }
 0x1c5   : > { %v468_v57 = vadd.f32 0.112945676, %v467_v56  ;;  %v457_v61 = vadd.f32 0.05243302, %v456_v58 }
 0x1c7   : > { %v469_v59 = vmul.f32 %v468_v57, %v451_v43  ;;  %v458_v0 = vmul.f32 %v457_v61, %v451_v43 }
 0x1c9   : > { %v470_v60 = vadd.f32 0.4994258, %v469_v59  ;;  %v459_v1 = vadd.f32 0.18741608, %v458_v0 }
 0x1cb   : > { %v471_v62 = vmul.f32 %v470_v60, %v451_v43  ;;  %v460_v3 = vmul.f32 %v459_v1, %v451_v43 }
 0x1cd   : > { %v472_v63 = vadd.f32 1.0, %v471_v62  ;;  %v461_v7 = vadd.f32 1.1283791, %v460_v3 }
 0x1cf   : > { %893 = vrcp.f32 %v472_v63  ;;  %v484_v6 = vand.u32 2147483648, %v472_v63  ;;  %v482_v9 = vand.u32 2147483647, %v472_v63  ;;  %vm478_vm5 = vweird.f32 %v472_v63 }
 0x1d0   : > { %v462_v12 = vmul.f32 %v461_v7, %v449_v40 }
 0x1d1   : > { %v485_v11 = vor.u32 1.1754944e-38, %v484_v6  ;;  %vm483_vm7 = vcmp.eq.f32.partialorder %v482_v9, 8.507059e+37 }
 0x1d5   : > { %v894_v2 = vpop.eup %893 }
 0x1d6   : > { %v474_v4 = vmul.f32 %v894_v2, %v472_v63  ;;  %vm479_vm4 = vweird.f32 %v894_v2 }
 0x1d7   : > { %vm480_vm6 = vmor %vm478_vm5, %vm479_vm4 }
 0x1d8   : > { %v475_v5 = vsub.f32 1.0, %v474_v4 }
 0x1da   : > { %v476_v8 = vmul.f32 %v894_v2, %v475_v5 }
 0x1dc   : > { %v477_v10 = vadd.f32 %v894_v2, %v476_v8 }
 0x1de   : > { %v481_v13 = vsel %vm480_vm6, %v894_v2, %v477_v10 }
 0x1df   : > { %v486_v14 = vsel %vm483_vm7, %v485_v11, %v481_v13 }
 0x1e0   : > { %v487_v15 = vmul.f32 %v486_v14, %v462_v12 }
 0x1e2   : > { %v751_v16 = vclamps-f32 %v487_v15, 1.0 }
 0x1e4   : > { %v490_v18 = vadd.f32 1.0, %v751_v16 }
 0x1e6   : > { %v491_v19 = vmul.f32 %v490_v18, %v448_v17 }
 0x1e8   : > { %v492_v20 = vpack.c.bf16 %v491_v19, %v491_v19 }
 0x1ea   : > { %569 = vmatmul.bf16.vlgmr.msra.gmra.mxu1 %v492_v20 }
 0x267   : > { %v570_v23 = vpop.f32.mrf.mxu1 }
 0x268   : > { %v571_v25 = vadd.f32 %v890_v21, %v570_v23 }
 0x26a   : > { %v575_v26 = vmul.f32 %v574_v22, %v571_v25 }
 0x26c   : > { %576 = vst [vmem:[%s331_s8] sm:$0xff] %v575_v26 }
 0x26d   : > { %1012 = shalt.err (!%p1009_p2)
}
 0x26e   : > { %814 = dma.vmem_to_hbm [thread:$0]  (%p1186_p0), %s592_s30, 128, %s594_s11, %s578_s24  }
 0x26f   : > { %v572_v24 = vpop.f32.mrf.mxu1 }
 0x270 PF: > { %s605_s20 = sand.u32 1, %s1051_s21   ;;  %p828_p4 = pnand %p710_p6, %p1193_p5 }
 0x271   : > { %s606_s27 = scalar_lea.sflag [#allocation4], %s605_s20 }
 0x272   : > { %p829_p7 = pneg %p828_p4 }
 0x274   : > { %1046 = dma.done.wait (%p829_p7), %s606_s27, 128  }
 0x275   : > { %1048 = vsyncadd (%p829_p7), %s606_s27, 4294967168  ;;  %s23_s26 = sadd.s32 1, %s1071_s26   ;;  %s1288_s21 = smov %s1055_s22 }
 0x276   : > { %p20_p11 = scmp.ge.s32.totalorder %s23_s26, 4   ;;  %s1289_s22 = smov %s1059_s23 }
 0x277   : > { %s1290_s23 = smov %s1191_s9  ;;  %s1291_s24 = smov %s1067_s25 }
 0x278   : > { %s1292_s25 = smov %s1294_s18  ;;  %22 = sbr.rel (!%p20_p11) target bundleno = 7 (0x7), region = 100 }
 0x27d   :  { %612 = vsyncpa [#allocation3], 1 }
 0x27e   :  { %614 = vsyncpa [#allocation3 + $0x1], 1 }
 0x27f   :  { %615 = vsyncpa [#allocation6], 1 }
 0x280   :  { %616 = vsyncpa [#allocation4], 1 }
 0x281   :  { %618 = vsyncpa [#allocation4 + $0x1], 1 }

</bundles_post_ra>
